<compile_context>
chip_gen: v7x
topology: tpu7x:2x2x1
jax: 0.10.0
libtpu: 0.0.40
codegen_flags: <defaults>
</compile_context>

<pallas_src>
import jax
import jax.numpy as jnp
from jax.experimental import pallas as pl
from jax.experimental.pallas import tpu as pltpu

LANE = 128


def _round_up(x, m):
    return (x + m - 1) // m * m


def encoder_kernel(x_ref, p_ref, out_ref):
    """x_ref: (R*C, P) bf16; p_ref: (3, P+8, P) bf16 (row P = bias);
    out_ref: (R, P) f32."""
    RC, P = x_ref.shape
    R = out_ref.shape[0]
    C = RC // R

    def linear(h_bf16, layer):
        w = p_ref[layer, pl.ds(0, P), :]                      # (P, P) bf16
        b = p_ref[layer, pl.ds(P, 1), :].astype(jnp.float32)  # (1, P) f32
        return jnp.dot(h_bf16, w, preferred_element_type=jnp.float32) + b

    # hidden layer 0: Linear + ReLU  (bias add / ReLU in f32)
    h = jnp.maximum(linear(x_ref[...], 0), 0.0)
    # hidden layer 1: Linear + ReLU
    h = jnp.maximum(linear(h.astype(jnp.bfloat16), 1), 0.0)

    # Class mean folded before the final Linear; done as an MXU matmul with an
    # iota-built (R, R*C) averaging matrix (no reshape, no XLU sublane reduce).
    rows = jax.lax.broadcasted_iota(jnp.int32, (R, RC), 0)
    cols = jax.lax.broadcasted_iota(jnp.int32, (R, RC), 1)
    in_group = (cols >= rows * C) & (cols < (rows + 1) * C)
    avg = jnp.where(in_group, jnp.float32(1.0 / C), jnp.float32(0.0))
    h_bar = jnp.dot(avg, h, preferred_element_type=jnp.float32)  # (R, P) f32

    # output layer: Linear only (no ReLU); lane-dense (R, 128) store
    out_ref[...] = linear(h_bar.astype(jnp.bfloat16), 2)


def encoder_forward(fv, params):
    """fv: (rounds, nclasses, ninput) f32.
    params: 3 x (W (in_dim, out_dim), b (1, out_dim)), f32."""
    R, C, D = fv.shape
    (w0, b0), (w1, b1), (w2, b2) = params
    nh = w2.shape[1]
    P = _round_up(max(D, nh), LANE)
    PROWS = P + 8  # P weight rows + 1 bias row, rounded up to a sublane multiple

    # ---- layout plumbing in the wrapper (free): reshape, pad, pack ----
    x = fv.reshape(R * C, D).astype(jnp.bfloat16)
    x_pad = jnp.zeros((R * C, P), jnp.bfloat16).at[:, :D].set(x)

    packed = jnp.zeros((3, PROWS, P), jnp.float32)
    for l, (w, b) in enumerate(params):
        din, dout = w.shape
        packed = packed.at[l, :din, :dout].set(w)
        packed = packed.at[l, P, :dout].set(b.reshape(-1))
    packed = packed.astype(jnp.bfloat16)

    flops = 2 * (R * C) * P * P * 2 + 2 * R * (R * C) * P + 2 * R * P * P
    bytes_accessed = x_pad.size * 2 + packed.size * 2 + R * P * 4

    vmem = pl.BlockSpec(memory_space=pltpu.MemorySpace.VMEM)
    out = pl.pallas_call(
        encoder_kernel,
        out_shape=jax.ShapeDtypeStruct((R, P), jnp.float32),
        in_specs=[vmem, vmem],
        out_specs=vmem,
        cost_estimate=pl.CostEstimate(
            flops=flops, transcendentals=0, bytes_accessed=bytes_accessed),
    )(x_pad, packed)
    return out[:, :nh]


def init_params(key, ninput, nh, nlayers):
    """Deterministic init mimicking PyTorch Linear default (uniform +-1/sqrt(fan_in)).
    Weights stored as (in_dim, out_dim)."""
    assert nlayers == 3, "this script instantiates the nlayers=3 configuration"
    dims = [(ninput, nh), (nh, nh), (nh, nh)]
    params = []
    for (din, dout) in dims:
        key, kw, kb = jax.random.split(key, 3)
        bound = 1.0 / (din ** 0.5)
        w = jax.random.uniform(kw, (din, dout), jnp.float32, -bound, bound)
        b = jax.random.uniform(kb, (1, dout), jnp.float32, -bound, bound)
        params.append((w, b))
    return params


def encoder_reference(fv, params):
    """Plain-JAX f32 reference for correctness checking."""
    R, C, D = fv.shape
    h = fv.reshape(R * C, D)
    (w0, b0), (w1, b1), (w2, b2) = params
    h = jnp.maximum(h @ w0 + b0, 0.0)
    h = jnp.maximum(h @ w1 + b1, 0.0)
    h = h @ w2 + b2
    return h.reshape(R, C, -1).mean(axis=1)


if __name__ == "__main__":
    rounds, nclasses, ninput, nh, nlayers = 2, 4, 32, 32, 3

    key = jax.random.PRNGKey(0)
    key, kx = jax.random.split(key)
    fv = jax.random.normal(kx, (rounds, nclasses, ninput), jnp.float32)
    params = init_params(key, ninput, nh, nlayers)

    out = encoder_forward(fv, params)
    out = jax.block_until_ready(out)

    ref = encoder_reference(fv, params)
    assert out.shape == (rounds, nh)
    # Loosened tolerance: matmul operands are bf16 (f32 accumulation), reference is pure f32.
    assert jnp.allclose(out, ref, atol=5e-2, rtol=5e-2), "mismatch vs reference"

    print("KERNEL_OK")
</pallas_src>

<mosaic_0001>
module attributes {stable_mosaic.version = 11 : i64} {
  func.func @encoder_kernel(%arg0: memref<8x128xbf16, #tpu.memory_space<vmem>>, %arg1: memref<3x136x128xbf16, #tpu.memory_space<vmem>>, %arg2: memref<2x128xf32, #tpu.memory_space<vmem>>) attributes {dimension_semantics = [], scalar_prefetch = 0 : i64, scratch_operands = 0 : i64, tpu.core_type = #tpu.core_type<tc>} {
    %c0 = arith.constant 0 : index
    %c0_0 = arith.constant 0 : index
    %0 = vector.load %arg0[%c0, %c0_0] : memref<8x128xbf16, #tpu.memory_space<vmem>>, vector<8x128xbf16>
    %c0_1 = arith.constant 0 : index
    %c0_2 = arith.constant 0 : index
    %c0_3 = arith.constant 0 : index
    %1 = vector.load %arg1[%c0_1, %c0_2, %c0_3] : memref<3x136x128xbf16, #tpu.memory_space<vmem>>, vector<1x128x128xbf16>
    %2 = vector.shape_cast %1 : vector<1x128x128xbf16> to vector<128x128xbf16>
    %c0_4 = arith.constant 0 : index
    %c128 = arith.constant 128 : index
    %c0_5 = arith.constant 0 : index
    %3 = vector.load %arg1[%c0_4, %c128, %c0_5] : memref<3x136x128xbf16, #tpu.memory_space<vmem>>, vector<1x1x128xbf16>
    %4 = vector.shape_cast %3 : vector<1x1x128xbf16> to vector<1x128xbf16>
    %5 = arith.extf %4 : vector<1x128xbf16> to vector<1x128xf32>
    %cst = arith.constant dense<0.000000e+00> : vector<8x128xf32>
    %6 = tpu.matmul %0, %2, %cst {dimension_numbers = #tpu.dot_dimension_numbers<[1], [0], [0], [1], [0, 0, 1, 1], [], []>} : vector<8x128xbf16>, vector<128x128xbf16>, vector<8x128xf32> -> vector<8x128xf32>
    %7 = vector.broadcast %5 : vector<1x128xf32> to vector<8x128xf32>
    %8 = arith.addf %6, %7 : vector<8x128xf32>
    %cst_6 = arith.constant 0.000000e+00 : f32
    %9 = vector.broadcast %cst_6 : f32 to vector<8x128xf32>
    %10 = arith.maximumf %8, %9 : vector<8x128xf32>
    %11 = arith.truncf %10 : vector<8x128xf32> to vector<8x128xbf16>
    %c1 = arith.constant 1 : index
    %c0_7 = arith.constant 0 : index
    %c0_8 = arith.constant 0 : index
    %12 = vector.load %arg1[%c1, %c0_7, %c0_8] : memref<3x136x128xbf16, #tpu.memory_space<vmem>>, vector<1x128x128xbf16>
    %13 = vector.shape_cast %12 : vector<1x128x128xbf16> to vector<128x128xbf16>
    %c1_9 = arith.constant 1 : index
    %c128_10 = arith.constant 128 : index
    %c0_11 = arith.constant 0 : index
    %14 = vector.load %arg1[%c1_9, %c128_10, %c0_11] : memref<3x136x128xbf16, #tpu.memory_space<vmem>>, vector<1x1x128xbf16>
    %15 = vector.shape_cast %14 : vector<1x1x128xbf16> to vector<1x128xbf16>
    %16 = arith.extf %15 : vector<1x128xbf16> to vector<1x128xf32>
    %cst_12 = arith.constant dense<0.000000e+00> : vector<8x128xf32>
    %17 = tpu.matmul %11, %13, %cst_12 {dimension_numbers = #tpu.dot_dimension_numbers<[1], [0], [0], [1], [0, 0, 1, 1], [], []>} : vector<8x128xbf16>, vector<128x128xbf16>, vector<8x128xf32> -> vector<8x128xf32>
    %18 = vector.broadcast %16 : vector<1x128xf32> to vector<8x128xf32>
    %19 = arith.addf %17, %18 : vector<8x128xf32>
    %cst_13 = arith.constant 0.000000e+00 : f32
    %20 = vector.broadcast %cst_13 : f32 to vector<8x128xf32>
    %21 = arith.maximumf %19, %20 : vector<8x128xf32>
    %22 = tpu.iota {dimensions = array<i32: 0>} : vector<2x8xi32>
    %23 = tpu.iota {dimensions = array<i32: 1>} : vector<2x8xi32>
    %c4_i32 = arith.constant 4 : i32
    %24 = vector.broadcast %c4_i32 : i32 to vector<2x8xi32>
    %25 = arith.muli %22, %24 : vector<2x8xi32>
    %26 = arith.cmpi sge, %23, %25 : vector<2x8xi32>
    %c1_i32 = arith.constant 1 : i32
    %27 = vector.broadcast %c1_i32 : i32 to vector<2x8xi32>
    %28 = arith.addi %22, %27 : vector<2x8xi32>
    %c4_i32_14 = arith.constant 4 : i32
    %29 = vector.broadcast %c4_i32_14 : i32 to vector<2x8xi32>
    %30 = arith.muli %28, %29 : vector<2x8xi32>
    %31 = arith.cmpi slt, %23, %30 : vector<2x8xi32>
    %32 = arith.andi %26, %31 : vector<2x8xi1>
    %cst_15 = arith.constant 2.500000e-01 : f32
    %cst_16 = arith.constant 0.000000e+00 : f32
    %33 = vector.broadcast %cst_15 : f32 to vector<2x8xf32>
    %34 = vector.broadcast %cst_16 : f32 to vector<2x8xf32>
    %35 = arith.select %32, %33, %34 : vector<2x8xi1>, vector<2x8xf32>
    %cst_17 = arith.constant dense<0.000000e+00> : vector<2x128xf32>
    %36 = tpu.matmul %35, %21, %cst_17 {dimension_numbers = #tpu.dot_dimension_numbers<[1], [0], [0], [1], [0, 0, 1, 1], [], []>} : vector<2x8xf32>, vector<8x128xf32>, vector<2x128xf32> -> vector<2x128xf32>
    %37 = arith.truncf %36 : vector<2x128xf32> to vector<2x128xbf16>
    %c2 = arith.constant 2 : index
    %c0_18 = arith.constant 0 : index
    %c0_19 = arith.constant 0 : index
    %38 = vector.load %arg1[%c2, %c0_18, %c0_19] : memref<3x136x128xbf16, #tpu.memory_space<vmem>>, vector<1x128x128xbf16>
    %39 = vector.shape_cast %38 : vector<1x128x128xbf16> to vector<128x128xbf16>
    %c2_20 = arith.constant 2 : index
    %c128_21 = arith.constant 128 : index
    %c0_22 = arith.constant 0 : index
    %40 = vector.load %arg1[%c2_20, %c128_21, %c0_22] : memref<3x136x128xbf16, #tpu.memory_space<vmem>>, vector<1x1x128xbf16>
    %41 = vector.shape_cast %40 : vector<1x1x128xbf16> to vector<1x128xbf16>
    %42 = arith.extf %41 : vector<1x128xbf16> to vector<1x128xf32>
    %cst_23 = arith.constant dense<0.000000e+00> : vector<2x128xf32>
    %43 = tpu.matmul %37, %39, %cst_23 {dimension_numbers = #tpu.dot_dimension_numbers<[1], [0], [0], [1], [0, 0, 1, 1], [], []>} : vector<2x128xbf16>, vector<128x128xbf16>, vector<2x128xf32> -> vector<2x128xf32>
    %44 = vector.broadcast %42 : vector<1x128xf32> to vector<2x128xf32>
    %45 = arith.addf %43, %44 : vector<2x128xf32>
    %c0_24 = arith.constant 0 : index
    %c0_25 = arith.constant 0 : index
    %46 = vector.load %arg2[%c0_24, %c0_25] : memref<2x128xf32, #tpu.memory_space<vmem>>, vector<2x128xf32>
    tpu.vector_store %arg2[%c0_24, %c0_25], %45 {strides = array<i32>} : memref<2x128xf32, #tpu.memory_space<vmem>>, vector<2x128xf32>,
    return
  }
}

</mosaic_0001>

<bundles_post_ra>
// kernel: tpu_custom_call.1
= control target key start
LH: loop header
LB: loop body
LE: loop exit
PB: predicated region body
PF: predicated region fallthrough
CT: control target
= control target key end

     0   :  { %7 = vsyncpa [#allocation3], 0  ;;  %s799_s0 = inlined_call_operand.hbm [shape: bf16[8,128], index: 0, kind: input, shape index: {}]   ;;  %s800_s1 = inlined_call_operand.hbm [shape: bf16[3,136,128], index: 1, kind: input, shape index: {}]   ;;  %s801_s2 = inlined_call_operand.hbm [shape: f32[2,128], index: 2, kind: output, shape index: {}]  }
   0x1   :  { %8 = vsyncpa [#allocation6], 0 }
   0x2   :  { %9 = vsyncpa [#allocation4], 0  ;;  %s700_s9 = smov [#allocation2]   ;;  %s701_s11 = smov [#allocation5]  }
   0x3   :  { %s16_s10 = sshll.u32 %s700_s9, 4  ;;  %s25_s12 = sshll.u32 %s701_s11, 4  ;;  %s17_s10 = int_to_ptr.vmem [resolvable:$true] %s16_s10  ;;  %s722_s12 = int_to_ptr.vmem [resolvable:$true] %s25_s12 }
   0x4   :  { %s628_s15 = scalar_lea.hbm %s799_s0, 64 }
   0x5   :  { %p629_p0 = scmp.ne.s32.totalorder %s799_s0, %s628_s15  ;;  %p632_p1 = scmp.lt.u32.totalorder %s628_s15, %s799_s0 }
   0x7   :  { %p634_p2 = pnand %p632_p1, %p629_p0 }
   0x9   :  { %637 = shalt.err (!%p634_p2)
}
   0xa   :  { %s638_s20 = scalar_lea.vmem %s17_s10, 64  ;;  %p643_p4 = scmp.lt.s32.totalorder %s17_s10, %s17_s10 }
   0xb   :  { %p639_p3 = scmp.ne.s32.totalorder %s17_s10, %s638_s20  ;;  %p644_p5 = scmp.lt.s32.totalorder %s638_s20, %s638_s20 }
   0xd   :  { %p645_p6 = por %p644_p5, %p643_p4 }
   0xf   :  { %p646_p7 = pnand %p645_p6, %p639_p3 }
  0x11   :  { %649 = shalt.err (!%p646_p7)
}
  0x12   :  { %19 = dma.hbm_to_vmem [thread:$0]  %s799_s0, 64, %s17_s10, [#allocation3]  }
  0x13   :  { %s650_s25 = scalar_lea.hbm %s800_s1, 3264 }
  0x14   :  { %p651_p8 = scmp.ne.s32.totalorder %s800_s1, %s650_s25  ;;  %p654_p9 = scmp.lt.u32.totalorder %s650_s25, %s800_s1 }
  0x16   :  { %p656_p10 = pnand %p654_p9, %p651_p8 }
  0x18   :  { %659 = shalt.err (!%p656_p10)
}
  0x19   :  { %s660_s30 = scalar_lea.vmem %s722_s12, 3264  ;;  %p665_p12 = scmp.lt.s32.totalorder %s722_s12, %s722_s12 }
  0x1a   :  { %p661_p11 = scmp.ne.s32.totalorder %s722_s12, %s660_s30  ;;  %p666_p13 = scmp.lt.s32.totalorder %s660_s30, %s660_s30 }
  0x1c   :  { %p667_p0 = por %p666_p13, %p665_p12 }
  0x1e   :  { %p668_p1 = pnand %p667_p0, %p661_p11 }
  0x20   :  { %671 = shalt.err (!%p668_p1)
}
  0x21   :  { %s702_s0 = smov 64   ;;  %s703_s3 = smov 4  }
  0x22   :  { %31 = dma.hbm_to_vmem [thread:$0]  %s800_s1, 3264, %s722_s12, [#allocation6], %s702_s0, %s702_s0, %s703_s3  }
  0x23   :  { %694 = dma.done.wait [#allocation3], 64  }
  0x24   :  { %695 = vsyncadd [#allocation3], 4294967232 }
  0x25   :  { %696 = dma.done.wait [#allocation6], 3264  }
  0x26   :  { %697 = vsyncadd [#allocation6], 4294964032  ;;  %v704_v0 = vmov 0.0   ;;  %vm705_vm0 = vmmov 0   ;;  %v604_v1 = vld [vmem:[#allocation5] sm:$0xff]   ;;  %v605_v2 = vld [vmem:[#allocation5 + $0x8] sm:$0xff]   ;;  %v58_v18 = vlaneseq }
  0x27   :  { %532 = vmatprep.subr.bf16.mxu0 %v704_v0  ;;  %548 = vmatprep.mubr.msk.bf16.mxu0 %vm705_vm0, %v704_v0  ;;  %v606_v3 = vld [vmem:[#allocation5 + $0x10] sm:$0xff]   ;;  %v612_v4 = vld [vmem:[#allocation5 + $0x44] sm:$0xff]   ;;  %v607_v5 = vld [vmem:[#allocation5 + $0x18] sm:$0xff]   ;;  %vm275_vm4 = vcmask 64512   ;;  %s706_s1 = smov [#allocation7]  }
  0x28   :  { %552 = vmatprep.subr.bf16.mxu1 %v704_v0  ;;  %568 = vmatprep.mubr.msk.bf16.mxu1 %vm705_vm0, %v704_v0  ;;  %v613_v6 = vld [vmem:[#allocation5 + $0x4c] sm:$0xff]   ;;  %v608_v7 = vld [vmem:[#allocation5 + $0x20] sm:$0xff]   ;;  %v614_v8 = vld [vmem:[#allocation5 + $0x54] sm:$0xff]   ;;  %v59_v19 = vshrl.u32 %v58_v18, 7  ;;  %v267_v41 = vand.u32 127, %v58_v18  ;;  %s468_s6 = sshll.u32 %s706_s1, 4  ;;  %s469_s6 = int_to_ptr.vmem [resolvable:$true] %s468_s6 }
  0x29   :  { %533 = vmatpush3.bf16.msra.mxu0 %v604_v1  ;;  %553 = vmatpush3.bf16.msra.mxu1 %v612_v4  ;;  %v609_v9 = vld [vmem:[#allocation5 + $0x28] sm:$0xff]   ;;  %v615_v10 = vld [vmem:[#allocation5 + $0x5c] sm:$0xff]   ;;  %v610_v11 = vld [vmem:[#allocation5 + $0x30] sm:$0xff]   ;;  %s672_s7 = scalar_lea.vmem %s469_s6, 32  ;;  %p677_p3 = scmp.lt.s32.totalorder %s469_s6, %s469_s6 }
  0x2a   :  { %534 = vmatprep.subr.bf16.mxu0 %v704_v0  ;;  %554 = vmatprep.subr.bf16.mxu1 %v704_v0  ;;  %v616_v12 = vld [vmem:[#allocation5 + $0x64] sm:$0xff]   ;;  %v611_v13 = vld [vmem:[#allocation5 + $0x38] sm:$0xff]   ;;  %v617_v14 = vld [vmem:[#allocation5 + $0x6c] sm:$0xff]   ;;  %v60_v22 = vsub.s32 0, %v59_v19  ;;  %v270_v38 = vadd.s32 1, %v59_v19  ;;  %v268_v42 = vmul.u32 4, %v59_v19  ;;  %p673_p2 = scmp.ne.s32.totalorder %s469_s6, %s672_s7  ;;  %p678_p4 = scmp.lt.s32.totalorder %s672_s7, %s672_s7 }
  0x2b   :  { %v39_v15 = vld [vmem:[#allocation2] sm:$0xf]  ;;  %v618_v16 = vld [vmem:[#allocation5 + $0x74] sm:$0xff]   ;;  %v56_v20 = vld [vmem:[#allocation5 + $0x40] sm:$0x1] }
  0x2c   :  { %v619_v17 = vld [vmem:[#allocation5 + $0x7c] sm:$0xff]   ;;  %v57_v21 = vunpack.c.l.bf16 %v56_v20  ;;  %v620_v31 = vld [vmem:[#allocation5 + $0x88] sm:$0xff]   ;;  %v621_v32 = vld [vmem:[#allocation5 + $0x90] sm:$0xff]   ;;  %v271_v43 = vmul.u32 4, %v270_v38  ;;  %vm269_vm1 = vcmp.ge.s32.totalorder %v267_v41, %v268_v42  ;;  %p679_p5 = por %p678_p4, %p677_p3 }
  0x2d   :  { %535 = vmatpush3.bf16.msra.mxu0 %v605_v2  ;;  %555 = vmatpush3.bf16.msra.mxu1 %v613_v6  ;;  %v622_v33 = vld [vmem:[#allocation5 + $0x98] sm:$0xff]   ;;  %v623_v34 = vld [vmem:[#allocation5 + $0xa0] sm:$0xff]   ;;  %v624_v35 = vld [vmem:[#allocation5 + $0xa8] sm:$0xff]  }
  0x2e   :  { %536 = vmatprep.subr.bf16.mxu0 %v704_v0  ;;  %556 = vmatprep.subr.bf16.mxu1 %v704_v0  ;;  %v61_v23 = vrot.slane %v57_v21, %v60_v22  ;;  %v625_v36 = vld [vmem:[#allocation5 + $0xb0] sm:$0xff]   ;;  %v626_v37 = vld [vmem:[#allocation5 + $0xb8] sm:$0xff]   ;;  %v169_v39 = vld [vmem:[#allocation5 + $0x84] sm:$0x1]  ;;  %vm272_vm2 = vcmp.lt.s32.totalorder %v267_v41, %v271_v43  ;;  %p680_p6 = pnand %p679_p5, %p673_p2 }
  0x2f   :  { %v170_v40 = vunpack.c.l.bf16 %v169_v39  ;;  %vm273_vm3 = vmand %vm269_vm1, %vm272_vm2  ;;  %v627_v52 = vld [vmem:[#allocation5 + $0xc0] sm:$0xff]   ;;  %v367_v56 = vld [vmem:[#allocation5 + $0xc8] sm:$0x1] }
  0x30   :  { %v274_v51 = vsel %vm273_vm3, 0.25, %v704_v0  ;;  %v368_v57 = vunpack.c.l.bf16 %v367_v56 }
  0x31   :  { %537 = vmatpush3.bf16.msra.mxu0 %v606_v3  ;;  %557 = vmatpush3.bf16.msra.mxu1 %v614_v8  ;;  %v174_v44 = vrot.slane %v170_v40, %v60_v22 }
  0x32   :  { %538 = vmatprep.subr.bf16.mxu0 %v704_v0  ;;  %558 = vmatprep.subr.bf16.mxu1 %v704_v0  ;;  %v372_v58 = vrot.slane %v368_v57, %v60_v22 }
  0x35   :  { %539 = vmatpush3.bf16.msra.mxu0 %v607_v5  ;;  %559 = vmatpush3.bf16.msra.mxu1 %v615_v10 }
  0x36   :  { %540 = vmatprep.subr.bf16.mxu0 %v704_v0  ;;  %560 = vmatprep.subr.bf16.mxu1 %v704_v0 }
  0x39   :  { %541 = vmatpush3.bf16.msra.mxu0 %v608_v7  ;;  %561 = vmatpush3.bf16.msra.mxu1 %v616_v12 }
  0x3a   :  { %542 = vmatprep.subr.bf16.mxu0 %v704_v0  ;;  %562 = vmatprep.subr.bf16.mxu1 %v704_v0 }
  0x3d   :  { %543 = vmatpush3.bf16.msra.mxu0 %v609_v9  ;;  %563 = vmatpush3.bf16.msra.mxu1 %v617_v14 }
  0x3e   :  { %544 = vmatprep.subr.bf16.mxu0 %v704_v0  ;;  %564 = vmatprep.subr.bf16.mxu1 %v704_v0 }
  0x41   :  { %545 = vmatpush3.bf16.msra.mxu0 %v610_v11  ;;  %565 = vmatpush3.bf16.msra.mxu1 %v618_v16 }
  0x42   :  { %546 = vmatprep.subr.bf16.mxu0 %v704_v0  ;;  %566 = vmatprep.subr.bf16.mxu1 %v704_v0 }
  0x45   :  { %547 = vmatpush3.bf16.msra.mxu0 %v611_v13  ;;  %567 = vmatpush3.bf16.msra.mxu1 %v619_v17 }
  0x46   :  { %572 = vmatprep.subr.mxu0 %v704_v0  ;;  %577 = vmatprep.subr.bf16.mxu1 %v704_v0 }
  0x48   :  { %549 = vmatmul.mubr.bf16.vlgmr.msra.gmra.mrb[0].mxu0 %v39_v15 }
  0x49   :  { %574 = vmatprep.mubr.msk.f32.mxu0 %vm705_vm0, %v704_v0 }
 0x11b   :  { %v144_v24 = vpop.f32.mrb[0].mxu0 }
 0x11c   :  { %v145_v25 = vadd.f32 %v144_v24, %v61_v23  ;;  %v550_v26 = vpop.f32.mrb[1].mxu0 }
 0x11d   :  { %v147_v27 = vpop.f32.mrb[2].mxu0 }
 0x11e   :  { %v150_v28 = vmax.f32 %v145_v25, 0.0  ;;  %v551_v29 = vpop.f32.mrb[3].mxu0 }
 0x120   :  { %v151_v30 = vpack.c.bf16 %v150_v28, %v150_v28 }
 0x122   :  { %569 = vmatmul.mubr.bf16.vlgmr.msra.gmra.mrb[0].mxu1 %v151_v30 }
 0x123   :  { %593 = vmatprep.mubr.msk.bf16.mxu1 %vm705_vm0, %v704_v0  ;;  %578 = vmatpush3.bf16.msra.mxu1 %v620_v31 }
 0x124   :  { %579 = vmatprep.subr.bf16.mxu1 %v704_v0 }
 0x127   :  { %580 = vmatpush3.bf16.msra.mxu1 %v621_v32 }
 0x128   :  { %581 = vmatprep.subr.bf16.mxu1 %v704_v0 }
 0x12b   :  { %582 = vmatpush3.bf16.msra.mxu1 %v622_v33 }
 0x12c   :  { %583 = vmatprep.subr.bf16.mxu1 %v704_v0 }
 0x12f   :  { %584 = vmatpush3.bf16.msra.mxu1 %v623_v34 }
 0x130   :  { %585 = vmatprep.subr.bf16.mxu1 %v704_v0 }
 0x133   :  { %586 = vmatpush3.bf16.msra.mxu1 %v624_v35 }
 0x134   :  { %587 = vmatprep.subr.bf16.mxu1 %v704_v0 }
 0x137   :  { %588 = vmatpush3.bf16.msra.mxu1 %v625_v36 }
 0x138   :  { %589 = vmatprep.subr.bf16.mxu1 %v704_v0 }
 0x13b   :  { %590 = vmatpush3.bf16.msra.mxu1 %v626_v37 }
 0x13c   :  { %591 = vmatprep.subr.bf16.mxu1 %v704_v0 }
 0x13f   :  { %592 = vmatpush3.bf16.msra.mxu1 %v627_v52 }
 0x1f5   :  { %v257_v45 = vpop.f32.mrb[0].mxu1 }
 0x1f6   :  { %v258_v46 = vadd.f32 %v257_v45, %v174_v44  ;;  %v570_v47 = vpop.f32.mrb[1].mxu1 }
 0x1f7   :  { %v260_v48 = vpop.f32.mrb[2].mxu1 }
 0x1f8   :  { %v263_v49 = vmax.f32 %v258_v46, 0.0  ;;  %v571_v50 = vpop.f32.mrb[3].mxu1 }
 0x1fa   :  { %573 = vmatpush3.msra.mxu0 %v263_v49 }
 0x1fb   :  { %575 = vmatmul.mubr.msk.f32.vlgmr.msra.gmra.mrb[4].mxu0 %vm275_vm4, %v274_v51 }
 0x2ce   :  { %v345_v53 = vpop.f32.mrb[4].mxu0 }
 0x2cf   :  { %v349_v54 = vpack.c.bf16 %v345_v53, %v345_v53  ;;  %v576_v55 = vpop.f32.mrb[5].mxu0 }
 0x2d1   :  { %594 = vmatmul.mubr.bf16.vlgmr.msra.gmra.mrb[4].mxu1 %v349_v54 }
 0x3a4   :  { %v455_v59 = vpop.f32.mrb[4].mxu1 }
 0x3a5   :  { %v456_v60 = vadd.f32 %v455_v59, %v372_v58  ;;  %v595_v61 = vpop.f32.mrb[5].mxu1 }
 0x3a6   :  { %v458_v62 = vpop.f32.mrb[6].mxu1 }
 0x3a7   :  { %461 = vst [vmem:[#allocation7] sm:$0x3] %v456_v60  ;;  %v596_v63 = vpop.f32.mrb[7].mxu1 }
 0x3a8   :  { %683 = shalt.err (!%p680_p6)
}
 0x3a9   :  { %s684_s10 = scalar_lea.hbm %s801_s2, 32 }
 0x3aa   :  { %p685_p7 = scmp.ne.s32.totalorder %s801_s2, %s684_s10  ;;  %p688_p8 = scmp.lt.u32.totalorder %s684_s10, %s801_s2 }
 0x3ac   :  { %p690_p9 = pnand %p688_p8, %p685_p7 }
 0x3ae   :  { %693 = shalt.err (!%p690_p9)
}
 0x3af   :  { %471 = dma.vmem_to_hbm [thread:$0]  %s469_s6, 32, %s801_s2, [#allocation4]  }
 0x3b0   :  { %698 = dma.done.wait [#allocation4], 32  }
 0x3b1   :  { %699 = vsyncadd [#allocation4], 4294967264 }
 0x3b2   :  { %475 = vsyncpa [#allocation3], 1 }
 0x3b3   :  { %476 = vsyncpa [#allocation6], 1 }
 0x3b4   :  { %477 = vsyncpa [#allocation4], 1 }

</bundles_post_ra>
